<compile_context>
chip_gen: v6e
topology: v6e:2x2x1
jax: 0.10.0
libtpu: 0.0.40
codegen_flags: <defaults>
</compile_context>

<pallas_src>
import jax
import jax.numpy as jnp
from jax.experimental import pallas as pl
from jax.experimental.pallas import tpu as pltpu


# --------------------------------------------------------------------------- #
# Kernel
# --------------------------------------------------------------------------- #
def _glove_loss_kernel(ce_ref, te_ref, side_ref, out_ref, acc_ref):
    # ce_ref, te_ref : [E, TB]  bf16/f32  (lane-dense gathered embedding columns)
    # side_ref       : [2, TB]  f32       (row 0: cb + ub - coocs, row 1: weighting)
    # out_ref        : [1, 128] f32       (per-core-split scalar, broadcast over lanes)
    # acc_ref        : [1, TB]  f32       (per-lane partial-sum accumulator)
    i = pl.program_id(1)  # reduction axis (tiles within this core split)

    @pl.when(i == 0)
    def _():
        acc_ref[...] = jnp.zeros_like(acc_ref)

    # Upcast to f32 before the multiply (v5e has no bf16 VALU; HBM bytes already halved).
    ce = ce_ref[...].astype(jnp.float32)
    te = te_ref[...].astype(jnp.float32)
    side = side_ref[...]

    # Per-batch-element dot product == bmm([B,1,E] x [B,E,1]).squeeze(2),
    # here a sublane reduction over E giving a lane-dense [1, TB] vector.
    inner = jnp.sum(ce * te, axis=0, keepdims=True)          # [1, TB]
    diff = inner + side[0:1, :]                              # + cb + ub - coocs
    acc_ref[...] += side[1:2, :] * diff * diff               # weighting * diff^2

    # Single cross-lane reduce, only once per core split.
    @pl.when(i == pl.num_programs(1) - 1)
    def _():
        s = jnp.sum(acc_ref[...])
        out_ref[...] = jnp.broadcast_to(s, out_ref.shape).astype(out_ref.dtype)


# --------------------------------------------------------------------------- #
# Tiling / VMEM budgeting helpers
# --------------------------------------------------------------------------- #
def _round_up(x, m):
    return ((x + m - 1) // m) * m


def _per_col_vmem_bytes(embed, emb_itemsize):
    """Padded VMEM bytes consumed per lane column of batch."""
    e_pad = max(8, embed)
    return (
        2 * 2 * e_pad * emb_itemsize  # ce/te input tiles x double buffering
        + 2 * 8 * 4                   # [2, TB] side slab (pads to 8 sublanes) x 2 bufs
        + 8 * 4                       # [1, TB] f32 accumulator (pads to 8 sublanes)
        + 3 * e_pad * 4               # headroom for in-kernel f32 upcast/product temps
    )


def _choose_tile_cols(embed, emb_itemsize, vmem_budget_bytes=16 * 1024 * 1024):
    cols = vmem_budget_bytes // _per_col_vmem_bytes(embed, emb_itemsize)
    cols = min(cols, 32768)  # keep the per-step working set modest
    return max(128, (cols // 128) * 128)


# --------------------------------------------------------------------------- #
# Forward wrapper
# --------------------------------------------------------------------------- #
def glove_forward(params, center_words, target_words, coocs, weighting,
                  *, tile_cols=None, num_core_splits=2):
    """center_words/target_words: int32 [B,1]; coocs/weighting: f32 [B,1] -> scalar f32."""
    cw = center_words.reshape(-1)
    tw = target_words.reshape(-1)
    B = int(cw.shape[0])

    emb_v = params["embedding_v"]   # [E, V] (stored pre-transposed, bf16)
    emb_u = params["embedding_u"]   # [E, V]
    E = int(emb_v.shape[0])
    emb_itemsize = jnp.dtype(emb_v.dtype).itemsize

    # XLA glue: gathers stay outside the kernel (rows are tiny at E=32; see TODO above).
    # Tables are stored [E, V] so the gather already produces the lane-dense layout.
    ce_t = emb_v[:, cw]                                       # [E, B]
    te_t = emb_u[:, tw]                                       # [E, B]
    cb = params["v_bias"][cw].astype(jnp.float32)             # [B]
    ub = params["u_bias"][tw].astype(jnp.float32)             # [B]
    bias_sum = cb + ub - coocs.reshape(-1).astype(jnp.float32)
    w = weighting.reshape(-1).astype(jnp.float32)
    side = jnp.stack([bias_sum, w], axis=0)                   # [2, B]

    # --- Tiling: batch maps to lanes; tiles are multiples of 128 lanes. ---
    b_padded = _round_up(B, 128)
    if tile_cols is None:
        tile_cols = _choose_tile_cols(E, emb_itemsize)
    tile_cols = max(128, (min(int(tile_cols), b_padded) // 128) * 128)
    num_tiles = -(-b_padded // tile_cols)
    n_splits = num_core_splits if num_tiles >= num_core_splits else 1
    num_tiles = _round_up(num_tiles, n_splits)
    # Rebalance tile width so every tile is full and padding stays below one tile.
    tile_cols = _round_up(-(-b_padded // num_tiles), 128)
    b_padded = num_tiles * tile_cols
    tiles_per_split = num_tiles // n_splits

    pad = b_padded - B
    if pad:
        # Zero padding => bias_sum = 0 and weighting = 0 => padded lanes contribute
        # exactly 0, so no per-step mask is needed anywhere in the kernel.
        ce_t = jnp.pad(ce_t, ((0, 0), (0, pad)))
        te_t = jnp.pad(te_t, ((0, 0), (0, pad)))
        side = jnp.pad(side, ((0, 0), (0, pad)))

    emb_map = lambda c, i, T=tiles_per_split: (0, c * T + i)
    out_map = lambda c, i: (0, c)

    # VMEM limit derived from actual padded tile usage (+ headroom), capped well
    # under v7x's 64 MiB physical VMEM per TensorCore.
    vmem_usage = tile_cols * _per_col_vmem_bytes(E, emb_itemsize) + (1 << 20)
    vmem_limit = int(min(48 << 20, max(16 << 20, vmem_usage + (8 << 20))))

    grid_spec = pltpu.PrefetchScalarGridSpec(
        num_scalar_prefetch=0,
        grid=(n_splits, tiles_per_split),
        in_specs=[
            pl.BlockSpec((E, tile_cols), emb_map),
            pl.BlockSpec((E, tile_cols), emb_map),
            pl.BlockSpec((2, tile_cols), emb_map),
        ],
        out_specs=pl.BlockSpec((1, 128), out_map),
        scratch_shapes=[pltpu.VMEM((1, tile_cols), jnp.float32)],
    )

    out = pl.pallas_call(
        _glove_loss_kernel,
        out_shape=jax.ShapeDtypeStruct((1, 128 * n_splits), jnp.float32),
        grid_spec=grid_spec,
        compiler_params=pltpu.CompilerParams(
            dimension_semantics=("parallel", "arbitrary"),  # core split || batch reduction
            vmem_limit_bytes=vmem_limit,
        ),
    )(ce_t, te_t, side)

    # One scalar per core split (broadcast across its 128-lane output block).
    return jnp.sum(out[0, ::128])


# --------------------------------------------------------------------------- #
# Params & reference
# --------------------------------------------------------------------------- #
def init_params(key, vocab_size, embed_size):
    # nn.Embedding default init: N(0, 1).
    # Embedding tables are stored pre-transposed [E, V] (lane-dense gather) and in
    # bfloat16 (halves HBM read bytes of the dominant traffic); biases stay f32.
    k1, k2, k3, k4 = jax.random.split(key, 4)
    return {
        "embedding_v": jax.random.normal(k1, (embed_size, vocab_size), jnp.float32
                                         ).astype(jnp.bfloat16),
        "embedding_u": jax.random.normal(k2, (embed_size, vocab_size), jnp.float32
                                         ).astype(jnp.bfloat16),
        "v_bias": jax.random.normal(k3, (vocab_size,), jnp.float32),
        "u_bias": jax.random.normal(k4, (vocab_size,), jnp.float32),
    }


def _reference(params, center_words, target_words, coocs, weighting):
    cw = center_words[:, 0]
    tw = target_words[:, 0]
    ce = params["embedding_v"][:, cw].astype(jnp.float32)     # [E, B]
    te = params["embedding_u"][:, tw].astype(jnp.float32)     # [E, B]
    inner = jnp.sum(ce * te, axis=0)                          # [B]
    cb = params["v_bias"][cw]
    ub = params["u_bias"][tw]
    diff = inner + cb + ub - coocs[:, 0]
    return jnp.sum(weighting[:, 0] * diff * diff)


# --------------------------------------------------------------------------- #
# Self-test
# --------------------------------------------------------------------------- #
if __name__ == "__main__":
    vocab_size, embed_size = 100, 32

    key = jax.random.PRNGKey(0)
    keys = jax.random.split(key, 13)
    params = init_params(keys[0], vocab_size, embed_size)

    def make_batch(kidx, batch):
        kc, kt, kco, kw = keys[kidx:kidx + 4]
        center = jax.random.randint(kc, (batch, 1), 0, vocab_size, jnp.int32)
        target = jax.random.randint(kt, (batch, 1), 0, vocab_size, jnp.int32)
        co = jax.random.uniform(kco, (batch, 1), jnp.float32, 0.0, 5.0)
        wt = jax.random.uniform(kw, (batch, 1), jnp.float32, 0.0, 1.0)
        return center, target, co, wt

    # 1) Tiny batch: single 128-lane tile, single core split, padded 8 -> 128.
    c1, t1, co1, w1 = make_batch(1, 8)
    loss1 = jax.block_until_ready(glove_forward(params, c1, t1, co1, w1))
    ref1 = _reference(params, c1, t1, co1, w1)
    assert jnp.allclose(loss1, ref1, rtol=1e-3, atol=1e-3), (loss1, ref1)

    # 2) Medium batch, default tiling: single full tile, padded 200 -> 256.
    c2, t2, co2, w2 = make_batch(5, 200)
    loss2 = jax.block_until_ready(glove_forward(params, c2, t2, co2, w2))
    ref2 = _reference(params, c2, t2, co2, w2)
    assert jnp.allclose(loss2, ref2, rtol=1e-3, atol=1e-2), (loss2, ref2)

    # 3) Larger batch with a forced small tile: multi-tile reduction + 2-way
    #    core split (parallel axis), padded 1000 -> 1024.
    c3, t3, co3, w3 = make_batch(9, 1000)
    loss3 = jax.block_until_ready(
        glove_forward(params, c3, t3, co3, w3, tile_cols=128))
    ref3 = _reference(params, c3, t3, co3, w3)
    assert jnp.allclose(loss3, ref3, rtol=1e-3, atol=1e-2), (loss3, ref3)

    print("KERNEL_OK")
</pallas_src>

<mosaic_0001>
module attributes {stable_mosaic.version = 11 : i64} {
  func.func @_glove_loss_kernel(%arg0: i32, %arg1: i32, %arg2: memref<32x128xbf16, #tpu.memory_space<vmem>>, %arg3: memref<32x128xbf16, #tpu.memory_space<vmem>>, %arg4: memref<2x128xf32, #tpu.memory_space<vmem>>, %arg5: memref<1x128xf32, #tpu.memory_space<vmem>>, %arg6: memref<1x128xf32, #tpu.memory_space<vmem>>) attributes {dimension_semantics = [#tpu.dimension_semantics<parallel>, #tpu.dimension_semantics<arbitrary>], iteration_bounds = array<i64: 1, 1>, scalar_prefetch = 0 : i64, scratch_operands = 1 : i64, tpu.core_type = #tpu.core_type<tc>, window_params = [{transform_indices = @transform_0, window_bounds = array<i64: 32, 128>}, {transform_indices = @transform_1, window_bounds = array<i64: 32, 128>}, {transform_indices = @transform_2, window_bounds = array<i64: 2, 128>}, {transform_indices = @transform_3, window_bounds = array<i64: 1, 128>}]} {
    %c0_i32 = arith.constant 0 : i32
    %0 = arith.cmpi eq, %arg1, %c0_i32 : i32
    %1 = arith.extui %0 : i1 to i32
    %c0_i32_0 = arith.constant 0 : i32
    %2 = arith.cmpi ne, %1, %c0_i32_0 : i32
    scf.if %2 {
      %cst_12 = arith.constant 0.000000e+00 : f32
      %22 = vector.broadcast %cst_12 : f32 to vector<1x128xf32>
      %c0_13 = arith.constant 0 : index
      %c0_14 = arith.constant 0 : index
      %23 = vector.load %arg6[%c0_13, %c0_14] : memref<1x128xf32, #tpu.memory_space<vmem>>, vector<1x128xf32>
      tpu.vector_store %arg6[%c0_13, %c0_14], %22 {strides = array<i32>} : memref<1x128xf32, #tpu.memory_space<vmem>>, vector<1x128xf32>,
    } else {
    }
    %c0 = arith.constant 0 : index
    %c0_1 = arith.constant 0 : index
    %3 = vector.load %arg2[%c0, %c0_1] : memref<32x128xbf16, #tpu.memory_space<vmem>>, vector<32x128xbf16>
    %4 = arith.extf %3 : vector<32x128xbf16> to vector<32x128xf32>
    %c0_2 = arith.constant 0 : index
    %c0_3 = arith.constant 0 : index
    %5 = vector.load %arg3[%c0_2, %c0_3] : memref<32x128xbf16, #tpu.memory_space<vmem>>, vector<32x128xbf16>
    %6 = arith.extf %5 : vector<32x128xbf16> to vector<32x128xf32>
    %c0_4 = arith.constant 0 : index
    %c0_5 = arith.constant 0 : index
    %7 = vector.load %arg4[%c0_4, %c0_5] : memref<2x128xf32, #tpu.memory_space<vmem>>, vector<2x128xf32>
    %8 = arith.mulf %4, %6 : vector<32x128xf32>
    %cst = arith.constant dense<0.000000e+00> : vector<128xf32>
    %9 = vector.multi_reduction <add>, %8, %cst [0] : vector<32x128xf32> to vector<128xf32>
    %10 = vector.shape_cast %9 : vector<128xf32> to vector<1x128xf32>
    %11 = vector.extract_strided_slice %7 {offsets = [0, 0], sizes = [1, 128], strides = [1, 1]} : vector<2x128xf32> to vector<1x128xf32>
    %12 = arith.addf %10, %11 : vector<1x128xf32>
    %c0_6 = arith.constant 0 : index
    %c0_7 = arith.constant 0 : index
    %13 = vector.load %arg6[%c0_6, %c0_7] : memref<1x128xf32, #tpu.memory_space<vmem>>, vector<1x128xf32>
    %14 = vector.extract_strided_slice %7 {offsets = [1, 0], sizes = [1, 128], strides = [1, 1]} : vector<2x128xf32> to vector<1x128xf32>
    %15 = arith.mulf %14, %12 : vector<1x128xf32>
    %16 = arith.mulf %15, %12 : vector<1x128xf32>
    %17 = arith.addf %13, %16 : vector<1x128xf32>
    %c0_8 = arith.constant 0 : index
    %c0_9 = arith.constant 0 : index
    %18 = vector.load %arg6[%c0_8, %c0_9] : memref<1x128xf32, #tpu.memory_space<vmem>>, vector<1x128xf32>
    tpu.vector_store %arg6[%c0_8, %c0_9], %17 {strides = array<i32>} : memref<1x128xf32, #tpu.memory_space<vmem>>, vector<1x128xf32>,
    %c0_i32_10 = arith.constant 0 : i32
    %19 = arith.cmpi eq, %arg1, %c0_i32_10 : i32
    %20 = arith.extui %19 : i1 to i32
    %c0_i32_11 = arith.constant 0 : i32
    %21 = arith.cmpi ne, %20, %c0_i32_11 : i32
    scf.if %21 {
      %c0_12 = arith.constant 0 : index
      %c0_13 = arith.constant 0 : index
      %22 = vector.load %arg6[%c0_12, %c0_13] : memref<1x128xf32, #tpu.memory_space<vmem>>, vector<1x128xf32>
      %23 = vector.shape_cast %22 : vector<1x128xf32> to vector<1x1x128xf32>
      %cst_14 = arith.constant dense<0.000000e+00> : vector<1xf32>
      %24 = vector.multi_reduction <add>, %23, %cst_14 [1, 2] : vector<1x1x128xf32> to vector<1xf32>
      %25 = vector.shape_cast %24 : vector<1xf32> to vector<1x1x1xf32>
      %26 = vector.extract %25[0, 0, 0] : f32 from vector<1x1x1xf32>
      %27 = vector.broadcast %26 : f32 to vector<1x128xf32>
      %c0_15 = arith.constant 0 : index
      %c0_16 = arith.constant 0 : index
      %28 = vector.load %arg5[%c0_15, %c0_16] : memref<1x128xf32, #tpu.memory_space<vmem>>, vector<1x128xf32>
      tpu.vector_store %arg5[%c0_15, %c0_16], %27 {strides = array<i32>} : memref<1x128xf32, #tpu.memory_space<vmem>>, vector<1x128xf32>,
    } else {
    }
    return
  }
  func.func @transform_0(%arg0: i32, %arg1: i32) -> (i32, i32) {
    %c1_i32 = arith.constant 1 : i32
    %0 = arith.muli %arg0, %c1_i32 : i32
    %1 = arith.addi %0, %arg1 : i32
    %c0_i32 = arith.constant 0 : i32
    %c0_i32_0 = arith.constant 0 : i32
    return %c0_i32, %1 : i32, i32
  }
  func.func @transform_1(%arg0: i32, %arg1: i32) -> (i32, i32) {
    %c1_i32 = arith.constant 1 : i32
    %0 = arith.muli %arg0, %c1_i32 : i32
    %1 = arith.addi %0, %arg1 : i32
    %c0_i32 = arith.constant 0 : i32
    %c0_i32_0 = arith.constant 0 : i32
    return %c0_i32, %1 : i32, i32
  }
  func.func @transform_2(%arg0: i32, %arg1: i32) -> (i32, i32) {
    %c1_i32 = arith.constant 1 : i32
    %0 = arith.muli %arg0, %c1_i32 : i32
    %1 = arith.addi %0, %arg1 : i32
    %c0_i32 = arith.constant 0 : i32
    %c0_i32_0 = arith.constant 0 : i32
    return %c0_i32, %1 : i32, i32
  }
  func.func @transform_3(%arg0: i32, %arg1: i32) -> (i32, i32) {
    %c0_i32 = arith.constant 0 : i32
    %c0_i32_0 = arith.constant 0 : i32
    return %c0_i32, %arg0 : i32, i32
  }
}

</mosaic_0001>

<bundles_post_ra>
// kernel: tpu_custom_call.1
= control target key start
LH: loop header
LB: loop body
LE: loop exit
PB: predicated region body
PF: predicated region fallthrough
CT: control target
= control target key end

     0   :  { %8 = vsyncpa [#allocation4], 0  ;;  %s300_s0 = inlined_call_operand.hbm [shape: bf16[32,128], index: 0, kind: input, shape index: {}]   ;;  %s301_s1 = inlined_call_operand.hbm [shape: bf16[32,128], index: 1, kind: input, shape index: {}]   ;;  %s302_s2 = inlined_call_operand.vmem [shape: f32[2,128], index: 2, kind: input, shape index: {}]   ;;  %s303_s3 = inlined_call_operand.hbm [shape: f32[1,128], index: 3, kind: output, shape index: {}]  }
   0x1   :  { %9 = vsyncpa [#allocation7], 0 }
   0x2   :  { %10 = vsyncpa [#allocation5], 0  ;;  %s261_s12 = smov [#allocation3]  }
   0x3   :  { %s19_s13 = sshll.u32 %s261_s12, 4  ;;  %s20_s13 = int_to_ptr.vmem [resolvable:$true] %s19_s13 }
   0x4   :  { %s203_s14 = scalar_lea.vmem %s20_s13, 256  ;;  %p208_p1 = scmp.lt.s32.totalorder %s20_s13, %s20_s13 }
   0x5   :  { %p204_p0 = scmp.ne.s32.totalorder %s20_s13, %s203_s14  ;;  %p209_p2 = scmp.lt.s32.totalorder %s203_s14, %s203_s14 }
   0x7   :  { %p210_p3 = por %p209_p2, %p208_p1 }
   0x9   :  { %p211_p4 = pnand %p210_p3, %p204_p0 }
   0xb   :  { %214 = shalt.err (!%p211_p4)
}
   0xc   :  { %s262_s15 = smov 64   ;;  %s263_s16 = smov 4  }
   0xd   :  { %25 = dma.hbm_to_vmem [thread:$0]  %s300_s0, 256, %s20_s13, [#allocation4], %s262_s15, %s262_s15, %s263_s16  }
   0xe   :  { %s264_s19 = smov [#allocation6]  }
   0xf   :  { %s34_s20 = sshll.u32 %s264_s19, 4  ;;  %s35_s20 = int_to_ptr.vmem [resolvable:$true] %s34_s20 }
  0x10   :  { %s223_s21 = scalar_lea.vmem %s35_s20, 256  ;;  %p228_p6 = scmp.lt.s32.totalorder %s35_s20, %s35_s20 }
  0x11   :  { %p224_p5 = scmp.ne.s32.totalorder %s35_s20, %s223_s21  ;;  %p229_p7 = scmp.lt.s32.totalorder %s223_s21, %s223_s21 }
  0x13   :  { %p230_p8 = por %p229_p7, %p228_p6 }
  0x15   :  { %p231_p9 = pnand %p230_p8, %p224_p5 }
  0x17   :  { %234 = shalt.err (!%p231_p9)
}
  0x18   :  { %40 = dma.hbm_to_vmem [thread:$0]  %s301_s1, 256, %s35_s20, [#allocation7], %s262_s15, %s262_s15, %s263_s16  }
  0x19   :  { %255 = dma.done.wait [#allocation4], 256  }
  0x1a   :  { %256 = vsyncadd [#allocation4], 4294967040 }
  0x1b   :  { %257 = dma.done.wait [#allocation7], 256  }
  0x1c   :  { %258 = vsyncadd [#allocation7], 4294967040  ;;  %v265_v0 = vmov 0.0   ;;  %v169_v1 = vld [vmem:[#allocation3] sm:$0xff]   ;;  %v184_v2 = vld [vmem:[#allocation3 + $0x8] sm:$0xff]   ;;  %v114_v27 = vlaneseq  ;;  %vm133_vm0 = vcmask 1040384  }
  0x1d   :  { %72 = vst [vmem:[#allocation2] sm:$0x1] %v265_v0  ;;  %v177_v3 = vld [vmem:[#allocation6] sm:$0xff]   ;;  %v170_v4 = vunpack.c.l.bf16 %v169_v1  ;;  %v171_v5 = vunpack.c.h.bf16 %v169_v1  ;;  %v174_v6 = vunpack.c.l.bf16 %v184_v2  ;;  %v175_v7 = vunpack.c.h.bf16 %v184_v2  ;;  %v185_v8 = vld [vmem:[#allocation6 + $0x8] sm:$0xff]  }
  0x1e   :  { %v178_v9 = vunpack.c.l.bf16 %v177_v3  ;;  %v179_v10 = vunpack.c.h.bf16 %v177_v3  ;;  %v182_v11 = vunpack.c.l.bf16 %v185_v8  ;;  %v183_v12 = vunpack.c.h.bf16 %v185_v8  ;;  %v89_v28 = vld [vmem:[%s302_s2] sm:$0x3]  ;;  %s267_s2 = smov [#allocation8]  }
  0x1f   :  { %v266_v25 = vmov 1966171168   ;;  %v115_v32 = vshrl.u32 %v114_v27, 7  ;;  %s152_s24 = sshll.u32 %s267_s2, 4  ;;  %s153_s24 = int_to_ptr.vmem [resolvable:$true] %s152_s24 }
  0x20   :  { %v90_v13 = vmul.f32 %v178_v9, %v170_v4  ;;  %v91_v14 = vmul.f32 %v179_v10, %v171_v5  ;;  %v92_v15 = vmul.f32 %v182_v11, %v174_v6  ;;  %v93_v16 = vmul.f32 %v183_v12, %v175_v7  ;;  %s235_s26 = scalar_lea.vmem %s153_s24, 16  ;;  %s239_s27 = scalar_lea.vmem %s153_s24, 32 }
  0x21   :  { %v112_v26 = vunpack.c.l.s4 %v266_v25  ;;  %p236_p10 = scmp.ne.s32.totalorder %s153_s24, %s235_s26  ;;  %p240_p11 = scmp.lt.s32.totalorder %s153_s24, %s153_s24 }
  0x22   :  { %v94_v17 = vadd.f32 %v91_v14, %v90_v13  ;;  %p241_p12 = scmp.lt.s32.totalorder %s239_s27, %s235_s26 }
  0x23   :  { %v113_v31 = vunpack.c.0.s8 %v112_v26 }
  0x24   :  { %v95_v18 = vadd.f32 %v94_v17, %v92_v15  ;;  %v104_v39 = vld [vmem:[#allocation2] sm:$0x1]  ;;  %p242_p13 = por %p241_p12, %p240_p11 }
  0x25   :  { %v116_v35 = vsub.s32 %v113_v31, %v115_v32 }
  0x26   :  { %v96_v19 = vadd.f32 %v95_v18, %v93_v16  ;;  %p243_p0 = pnand %p242_p13, %p236_p10 }
  0x28   :  { %v97_v20 = vrot.slane %v96_v19, 4 }
  0x2a   :  { %v98_v21 = vadd.f32 %v97_v20, %v96_v19 }
  0x2c   :  { %v99_v22 = vrot.slane %v98_v21, 2 }
  0x2e   :  { %v100_v23 = vadd.f32 %v99_v22, %v98_v21 }
  0x30   :  { %v101_v24 = vrot.slane %v100_v23, 1 }
  0x32   :  { %v102_v29 = vadd.f32 %v101_v24, %v100_v23 }
  0x34   :  { %v103_v30 = vadd.f32 %v102_v29, %v89_v28 }
  0x36   :  { %v106_v33 = vrot.slane %v103_v30, 7 }
  0x38   :  { %v108_v34 = vmul.f32 %v106_v33, %v89_v28 }
  0x3a   :  { %v109_v36 = vmul.f32 %v108_v34, %v106_v33 }
  0x3c   :  { %v117_v37 = vrot.slane %v109_v36, %v116_v35 }
  0x3e   :  { %v118_v38 = vcombine.high %v117_v37, %v117_v37 }
  0x40   :  { %v125_v40 = vrot.slane %v118_v38, %v116_v35 }
  0x42   :  { %v127_v41 = vadd.f32 %v125_v40, %v104_v39 }
  0x44   :  { %128 = vst [vmem:[#allocation2] sm:$0x1] %v127_v41 }
  0x4b   :  { %v132_v42 = vld [vmem:[#allocation2] sm:$0x1] }
  0x4c   :  { %v134_v43 = vsel %vm133_vm0, %v132_v42, 0.0 }
  0x4d   :  { %135 = vadd.xlane.f32.xlu0 %v134_v43 }
  0xd6   :  { %v136_v44 = vpop.xlane.xlu0 %135 }
  0xd7   :  { %v137_v45 = vrot.slane %v136_v44, 4 }
  0xd9   :  { %v138_v46 = vadd.f32 %v137_v45, %v136_v44 }
  0xdb   :  { %v139_v47 = vrot.slane %v138_v46, 2 }
  0xdd   :  { %v140_v48 = vadd.f32 %v139_v47, %v138_v46 }
  0xdf   :  { %v141_v49 = vrot.slane %v140_v48, 1 }
  0xe1   :  { %v142_v50 = vadd.f32 %v141_v49, %v140_v48 }
  0xe3   :  { %186 = vpush %v142_v50 }
 0x114   :  { %s187_s25 = spop %186 }
 0x115   :  { %v144_v51 = vstv %s187_s25 }
 0x116   :  { %145 = vst [vmem:[#allocation8] sm:$0x1] %v144_v51 }
 0x117   :  { %246 = shalt.err (!%p243_p0)
}
 0x118   :  { %155 = dma.vmem_to_hbm [thread:$0]  %s153_s24, 16, %s303_s3, [#allocation5]  }
 0x119   :  { %259 = dma.done.wait [#allocation5], 16  }
 0x11a   :  { %260 = vsyncadd [#allocation5], 4294967280 }
 0x11b   :  { %159 = vsyncpa [#allocation4], 1 }
 0x11c   :  { %160 = vsyncpa [#allocation7], 1 }
 0x11d   :  { %161 = vsyncpa [#allocation5], 1 }

</bundles_post_ra>
